<compile_context>
chip_gen: v6e
topology: v6e:2x2x1
jax: 0.10.0
libtpu: 0.0.40
codegen_flags: <defaults>
</compile_context>

<pallas_src>
import functools

import numpy as np
import jax
import jax.numpy as jnp
from jax import lax
from jax.experimental import pallas as pl
from jax.experimental.pallas import tpu as pltpu


# ----------------------------------------------------------------------------
# Shared in-kernel math
# ----------------------------------------------------------------------------

def _sigmoid(v):
    return 1.0 / (1.0 + jnp.exp(-v))


def _ln_relu(v):
    # F.layer_norm(., [C,1,1]) — no affine (functional layer_norm default) — then ReLU.
    mu = jnp.mean(v, axis=-1, keepdims=True)
    var = jnp.mean(jnp.square(v - mu), axis=-1, keepdims=True)
    return jnp.maximum((v - mu) * lax.rsqrt(var + 1e-5), 0.0)


def _transform(context, w1, b1, w2, b2, C):
    """Both transform branches fused: (1,C) -> (scale (1,C), shift (1,C))."""
    # First 1x1 convs of both branches as ONE lane-dense GEMM: (1,C)@(C,2C).
    t = jnp.dot(context, w1, preferred_element_type=jnp.float32) + b1      # (1, 2C)
    tn = jnp.concatenate([_ln_relu(t[:, :C]), _ln_relu(t[:, C:])], axis=-1)
    # Second 1x1 convs as ONE block-diagonal GEMM: (1,2C)@(2C,2C).
    o = jnp.dot(tn, w2, preferred_element_type=jnp.float32) + b2           # (1, 2C)
    return _sigmoid(o[:, :C]), o[:, C:]


def _context_logits(cw, cb, x):
    """Lane-dense context logits: (1,C) contract C with (S,C) -> (1,S) on the MXU."""
    return lax.dot_general(
        cw, x, (((1,), (1,)), ((), ())),
        preferred_element_type=jnp.float32) + cb


# ----------------------------------------------------------------------------
# Kernels
# ----------------------------------------------------------------------------

def _gcb_fused_kernel(x_ref, cw_ref, cb_ref, w1_ref, b1_ref, w2_ref, b2_ref,
                      o_ref):
    x = x_ref[0]                                                    # (S, C) f32
    C = x.shape[1]

    logits = _context_logits(cw_ref[...], cb_ref[...], x)           # (1, S)
    m = jnp.max(logits, axis=-1, keepdims=True)
    e = jnp.exp(logits - m)                                         # (1, S)
    denom = jnp.sum(e, axis=-1, keepdims=True)                      # (1, 1)

    # Softmax-weighted pooling on the MXU with unnormalized weights, then one
    # divide: context[c] = sum_s e[s] * x[s, c] / sum_s e[s].
    context = jnp.dot(e, x, preferred_element_type=jnp.float32) / denom    # (1, C)

    scale, shift = _transform(context, w1_ref[...], b1_ref[...],
                              w2_ref[...], b2_ref[...], C)

    # Apply fused: x is already resident in VMEM — no HBM re-read.
    o_ref[0] = x * scale + shift


def _gcb_context_stream_kernel(x_ref, cw_ref, cb_ref, w1_ref, b1_ref,
                               w2_ref, b2_ref, scale_ref, shift_ref,
                               m_sc, l_sc, acc_sc):
    s = pl.program_id(1)

    @pl.when(s == 0)
    def _():
        m_sc[...] = jnp.full(m_sc.shape, -jnp.inf, m_sc.dtype)
        l_sc[...] = jnp.zeros(l_sc.shape, l_sc.dtype)
        acc_sc[...] = jnp.zeros(acc_sc.shape, acc_sc.dtype)

    x = x_ref[0]                                                    # (ts, C)
    C = x.shape[1]

    logits = _context_logits(cw_ref[...], cb_ref[...], x)           # (1, ts)
    m_new = jnp.maximum(m_sc[...], jnp.max(logits, axis=-1, keepdims=True))
    alpha = jnp.exp(m_sc[...] - m_new)
    e = jnp.exp(logits - m_new)                                     # (1, ts)
    l_sc[...] = alpha * l_sc[...] + jnp.sum(e, axis=-1, keepdims=True)
    acc_sc[...] = alpha * acc_sc[...] + jnp.dot(
        e, x, preferred_element_type=jnp.float32)
    m_sc[...] = m_new

    @pl.when(s == pl.num_programs(1) - 1)
    def _():
        context = acc_sc[...] / l_sc[...]                           # (1, C)
        scale, shift = _transform(context, w1_ref[...], b1_ref[...],
                                  w2_ref[...], b2_ref[...], C)
        scale_ref[0] = scale
        shift_ref[0] = shift


def _apply_kernel(x_ref, scale_ref, shift_ref, o_ref):
    # y = x * scale + shift, broadcast over the spatial tile.
    o_ref[0] = x_ref[0] * scale_ref[0] + shift_ref[0]


# ----------------------------------------------------------------------------
# Wrapper
# ----------------------------------------------------------------------------

def pack_params(p):
    """Precompute packed weights ONCE at parameter-load time (not per forward)."""
    C = p['t0w1'].shape[0]
    w1 = jnp.concatenate([p['t0w1'].T, p['t1w1'].T], axis=1).astype(jnp.float32)
    b1 = jnp.concatenate([p['t0b1'], p['t1b1']]).reshape(1, 2 * C).astype(jnp.float32)
    w2 = jnp.zeros((2 * C, 2 * C), jnp.float32)
    w2 = w2.at[:C, :C].set(p['t0w2'].T).at[C:, C:].set(p['t1w2'].T)   # block-diag
    b2 = jnp.concatenate([p['t0b2'], p['t1b2']]).reshape(1, 2 * C).astype(jnp.float32)
    cw = p['ctx_w'].reshape(1, C).astype(jnp.float32)                 # row vector
    cb = p['ctx_b'].reshape(1, 1).astype(jnp.float32)
    return {'cw': cw, 'cb': cb, 'w1': w1, 'b1': b1, 'w2': w2, 'b2': b2}


def _pick_spatial_tile(S, max_tile=2048):
    if S <= max_tile:
        return S
    for t in range(max_tile, 7, -1):
        if S % t == 0 and t % 8 == 0:
            return t
    # TODO(synk): irregular S with no multiple-of-8 divisor falls back to one
    # full-S block; a masked remainder tile would be needed for huge odd S.
    return S


# Conservative vs v7x's 64 MiB physical VMEM (x in + y out, double-buffered).
_FUSED_VMEM_BUDGET = 48 << 20


def global_context_block(x_nchw, pk, *, fused_budget_bytes=_FUSED_VMEM_BUDGET,
                         stream_tile=None):
    """GlobalContextBlock forward.  x_nchw: (B, C, H, W) float32.

    pk: packed params from pack_params().
    """
    x = x_nchw.astype(jnp.float32)
    B, C, H, W = x.shape
    S = H * W
    x3 = jnp.transpose(x, (0, 2, 3, 1)).reshape(B, S, C)            # channels-last

    cw, cb = pk['cw'], pk['cb']
    w1, b1, w2, b2 = pk['w1'], pk['b1'], pk['w2'], pk['b2']

    weight_bytes = 4 * (cw.size + cb.size + w1.size + b1.size + w2.size + b2.size)
    # x input block + output block, each double-buffered, plus weights + slack.
    fused_bytes = 4 * (S * C * 4) + 2 * weight_bytes + (1 << 20)

    if fused_bytes <= fused_budget_bytes:
        # ---- fast path: single fused kernel, x read from HBM exactly once ----
        vmem_limit = int(min(max(fused_bytes + (4 << 20), 32 << 20), 56 << 20))
        y3 = pl.pallas_call(
            _gcb_fused_kernel,
            out_shape=jax.ShapeDtypeStruct((B, S, C), jnp.float32),
            grid=(B,),
            in_specs=[
                pl.BlockSpec((1, S, C), lambda b: (b, 0, 0)),
                pl.BlockSpec((1, C), lambda b: (0, 0)),
                pl.BlockSpec((1, 1), lambda b: (0, 0)),
                pl.BlockSpec((C, 2 * C), lambda b: (0, 0)),
                pl.BlockSpec((1, 2 * C), lambda b: (0, 0)),
                pl.BlockSpec((2 * C, 2 * C), lambda b: (0, 0)),
                pl.BlockSpec((1, 2 * C), lambda b: (0, 0)),
            ],
            out_specs=pl.BlockSpec((1, S, C), lambda b: (b, 0, 0)),
            compiler_params=pltpu.CompilerParams(
                dimension_semantics=("parallel",),
                vmem_limit_bytes=vmem_limit),
        )(x3, cw, cb, w1, b1, w2, b2)
    else:
        # ---- large-S fallback: streamed online-softmax context + apply pass ----
        ts = stream_tile if stream_tile is not None else _pick_spatial_tile(S)
        n_s = S // ts

        scale, shift = pl.pallas_call(
            _gcb_context_stream_kernel,
            out_shape=(jax.ShapeDtypeStruct((B, 1, C), jnp.float32),
                       jax.ShapeDtypeStruct((B, 1, C), jnp.float32)),
            grid=(B, n_s),
            in_specs=[
                pl.BlockSpec((1, ts, C), lambda b, s: (b, s, 0)),
                pl.BlockSpec((1, C), lambda b, s: (0, 0)),
                pl.BlockSpec((1, 1), lambda b, s: (0, 0)),
                pl.BlockSpec((C, 2 * C), lambda b, s: (0, 0)),
                pl.BlockSpec((1, 2 * C), lambda b, s: (0, 0)),
                pl.BlockSpec((2 * C, 2 * C), lambda b, s: (0, 0)),
                pl.BlockSpec((1, 2 * C), lambda b, s: (0, 0)),
            ],
            out_specs=(pl.BlockSpec((1, 1, C), lambda b, s: (b, 0, 0)),
                       pl.BlockSpec((1, 1, C), lambda b, s: (b, 0, 0))),
            scratch_shapes=[pltpu.VMEM((1, 1), jnp.float32),   # running max
                            pltpu.VMEM((1, 1), jnp.float32),   # running sum
                            pltpu.VMEM((1, C), jnp.float32)],  # running weighted sum
            compiler_params=pltpu.CompilerParams(
                dimension_semantics=("parallel", "arbitrary"),
                vmem_limit_bytes=64 << 20),
        )(x3, cw, cb, w1, b1, w2, b2)

        y3 = pl.pallas_call(
            _apply_kernel,
            out_shape=jax.ShapeDtypeStruct((B, S, C), jnp.float32),
            grid=(B, n_s),
            in_specs=[
                pl.BlockSpec((1, ts, C), lambda b, s: (b, s, 0)),
                pl.BlockSpec((1, 1, C), lambda b, s: (b, 0, 0)),
                pl.BlockSpec((1, 1, C), lambda b, s: (b, 0, 0)),
            ],
            out_specs=pl.BlockSpec((1, ts, C), lambda b, s: (b, s, 0)),
            compiler_params=pltpu.CompilerParams(
                dimension_semantics=("parallel", "parallel"),
                vmem_limit_bytes=64 << 20),
        )(x3, scale, shift)

    return jnp.transpose(y3.reshape(B, H, W, C), (0, 3, 1, 2))


# ----------------------------------------------------------------------------
# Pure-JAX reference (matches the PyTorch module) and parameter init
# ----------------------------------------------------------------------------

def reference_gcb(x, p):
    B, C, H, W = x.shape
    hp = jax.lax.Precision.HIGHEST
    xf = x.reshape(B, C, H * W)
    logits = jnp.einsum('bcs,oc->bos', xf, p['ctx_w'], precision=hp)[:, 0] \
        + p['ctx_b']
    mask = jax.nn.softmax(logits, axis=-1)                           # (B, S)
    context = jnp.einsum('bcs,bs->bc', xf, mask, precision=hp)       # (B, C)

    def transform(w1, b1, w2, b2):
        t = jnp.einsum('bc,oc->bo', context, w1, precision=hp) + b1
        mu = jnp.mean(t, axis=-1, keepdims=True)
        var = jnp.mean(jnp.square(t - mu), axis=-1, keepdims=True)
        t = jnp.maximum((t - mu) * jax.lax.rsqrt(var + 1e-5), 0.0)
        return jnp.einsum('bc,oc->bo', t, w2, precision=hp) + b2

    t0 = jax.nn.sigmoid(transform(p['t0w1'], p['t0b1'], p['t0w2'], p['t0b2']))
    t1 = transform(p['t1w1'], p['t1b1'], p['t1w2'], p['t1b2'])
    return x * t0[:, :, None, None] + t1[:, :, None, None]


def init_params(key, C):
    ks = list(jax.random.split(key, 10))

    def lin(k, o, i):
        return jax.random.normal(k, (o, i), jnp.float32) / np.sqrt(i)

    def bias(k, n):
        return 0.05 * jax.random.normal(k, (n,), jnp.float32)

    return {
        'ctx_w': lin(ks[0], 1, C), 'ctx_b': bias(ks[1], 1),
        't0w1': lin(ks[2], C, C), 't0b1': bias(ks[3], C),
        't0w2': lin(ks[4], C, C), 't0b2': bias(ks[5], C),
        't1w1': lin(ks[6], C, C), 't1b1': bias(ks[7], C),
        't1w2': lin(ks[8], C, C), 't1b2': bias(ks[9], C),
    }


# ----------------------------------------------------------------------------

if __name__ == "__main__":
    key = jax.random.PRNGKey(0)
    kx, kp = jax.random.split(key)

    # Small shapes consistent with where this block sits (UNet bottleneck):
    # C = 128 keeps the channel axis lane-dense.
    B, C, H, W = 2, 128, 16, 16
    x = jax.random.normal(kx, (B, C, H, W), jnp.float32)
    params = init_params(kp, C)
    packed = pack_params(params)          # hoisted out of the jitted forward

    ref = jax.block_until_ready(reference_gcb(x, params))

    # Fast (fused) path.
    fwd = jax.jit(global_context_block)
    y = jax.block_until_ready(fwd(x, packed))
    assert y.shape == (B, C, H, W), y.shape
    np.testing.assert_allclose(np.asarray(y), np.asarray(ref),
                               rtol=2e-3, atol=2e-3)

    # Large-S fallback path (forced, with multiple spatial tiles to exercise
    # the online-softmax accumulation).
    fwd_stream = jax.jit(functools.partial(
        global_context_block, fused_budget_bytes=0, stream_tile=64))
    y_s = jax.block_until_ready(fwd_stream(x, packed))
    np.testing.assert_allclose(np.asarray(y_s), np.asarray(ref),
                               rtol=2e-3, atol=2e-3)

    print("KERNEL_OK")
</pallas_src>

<mosaic_0001>
module attributes {stable_mosaic.version = 11 : i64} {
  func.func @_gcb_fused_kernel(%arg0: i32, %arg1: memref<1x256x128xf32, #tpu.memory_space<vmem>>, %arg2: memref<1x128xf32, #tpu.memory_space<vmem>>, %arg3: memref<1x1xf32, #tpu.memory_space<vmem>>, %arg4: memref<128x256xf32, #tpu.memory_space<vmem>>, %arg5: memref<1x256xf32, #tpu.memory_space<vmem>>, %arg6: memref<256x256xf32, #tpu.memory_space<vmem>>, %arg7: memref<1x256xf32, #tpu.memory_space<vmem>>, %arg8: memref<1x256x128xf32, #tpu.memory_space<vmem>>) attributes {dimension_semantics = [#tpu.dimension_semantics<parallel>], iteration_bounds = array<i64: 2>, scalar_prefetch = 0 : i64, scratch_operands = 0 : i64, tpu.core_type = #tpu.core_type<tc>, window_params = [{transform_indices = @transform_0, window_bounds = array<i64: 1, 256, 128>}, {pipeline_mode = #tpu.pipeline_mode<synchronous>, transform_indices = @transform_1, window_bounds = array<i64: 1, 128>}, {pipeline_mode = #tpu.pipeline_mode<synchronous>, transform_indices = @transform_2, window_bounds = array<i64: 1, 1>}, {pipeline_mode = #tpu.pipeline_mode<synchronous>, transform_indices = @transform_3, window_bounds = array<i64: 128, 256>}, {pipeline_mode = #tpu.pipeline_mode<synchronous>, transform_indices = @transform_4, window_bounds = array<i64: 1, 256>}, {pipeline_mode = #tpu.pipeline_mode<synchronous>, transform_indices = @transform_5, window_bounds = array<i64: 256, 256>}, {pipeline_mode = #tpu.pipeline_mode<synchronous>, transform_indices = @transform_6, window_bounds = array<i64: 1, 256>}, {transform_indices = @transform_7, window_bounds = array<i64: 1, 256, 128>}]} {
    %c0 = arith.constant 0 : index
    %c0_0 = arith.constant 0 : index
    %c0_1 = arith.constant 0 : index
    %0 = vector.load %arg1[%c0, %c0_0, %c0_1] : memref<1x256x128xf32, #tpu.memory_space<vmem>>, vector<1x256x128xf32>
    %1 = vector.shape_cast %0 : vector<1x256x128xf32> to vector<256x128xf32>
    %c0_2 = arith.constant 0 : index
    %c0_3 = arith.constant 0 : index
    %2 = vector.load %arg2[%c0_2, %c0_3] : memref<1x128xf32, #tpu.memory_space<vmem>>, vector<1x128xf32>
    %c0_4 = arith.constant 0 : index
    %c0_5 = arith.constant 0 : index
    %3 = vector.load %arg3[%c0_4, %c0_5] : memref<1x1xf32, #tpu.memory_space<vmem>>, vector<1x1xf32>
    %cst = arith.constant dense<0.000000e+00> : vector<1x256xf32>
    %4 = tpu.matmul %2, %1, %cst {dimension_numbers = #tpu.dot_dimension_numbers<[1], [1], [0], [0], [0, 0, 1, 0], [], []>} : vector<1x128xf32>, vector<256x128xf32>, vector<1x256xf32> -> vector<1x256xf32>
    %5 = vector.broadcast %3 : vector<1x1xf32> to vector<1x256xf32>
    %6 = arith.addf %4, %5 : vector<1x256xf32>
    %cst_6 = arith.constant dense<0xFF800000> : vector<1xf32>
    %7 = vector.multi_reduction <maximumf>, %6, %cst_6 [1] : vector<1x256xf32> to vector<1xf32>
    %8 = vector.shape_cast %7 : vector<1xf32> to vector<1x1xf32>
    %9 = vector.broadcast %8 : vector<1x1xf32> to vector<1x256xf32>
    %10 = arith.subf %6, %9 : vector<1x256xf32>
    %11 = math.exp %10 : vector<1x256xf32>
    %cst_7 = arith.constant dense<0.000000e+00> : vector<1xf32>
    %12 = vector.multi_reduction <add>, %11, %cst_7 [1] : vector<1x256xf32> to vector<1xf32>
    %13 = vector.shape_cast %12 : vector<1xf32> to vector<1x1xf32>
    %cst_8 = arith.constant dense<0.000000e+00> : vector<1x128xf32>
    %14 = tpu.matmul %11, %1, %cst_8 {dimension_numbers = #tpu.dot_dimension_numbers<[1], [0], [0], [1], [0, 0, 1, 1], [], []>} : vector<1x256xf32>, vector<256x128xf32>, vector<1x128xf32> -> vector<1x128xf32>
    %15 = vector.broadcast %13 : vector<1x1xf32> to vector<1x128xf32>
    %16 = arith.divf %14, %15 : vector<1x128xf32>
    %c0_9 = arith.constant 0 : index
    %c0_10 = arith.constant 0 : index
    %17 = vector.load %arg4[%c0_9, %c0_10] : memref<128x256xf32, #tpu.memory_space<vmem>>, vector<128x256xf32>
    %c0_11 = arith.constant 0 : index
    %c0_12 = arith.constant 0 : index
    %18 = vector.load %arg5[%c0_11, %c0_12] : memref<1x256xf32, #tpu.memory_space<vmem>>, vector<1x256xf32>
    %c0_13 = arith.constant 0 : index
    %c0_14 = arith.constant 0 : index
    %19 = vector.load %arg6[%c0_13, %c0_14] : memref<256x256xf32, #tpu.memory_space<vmem>>, vector<256x256xf32>
    %c0_15 = arith.constant 0 : index
    %c0_16 = arith.constant 0 : index
    %20 = vector.load %arg7[%c0_15, %c0_16] : memref<1x256xf32, #tpu.memory_space<vmem>>, vector<1x256xf32>
    %cst_17 = arith.constant dense<0.000000e+00> : vector<1x256xf32>
    %21 = tpu.matmul %16, %17, %cst_17 {dimension_numbers = #tpu.dot_dimension_numbers<[1], [0], [0], [1], [0, 0, 1, 1], [], []>} : vector<1x128xf32>, vector<128x256xf32>, vector<1x256xf32> -> vector<1x256xf32>
    %22 = arith.addf %21, %18 : vector<1x256xf32>
    %23 = vector.extract_strided_slice %22 {offsets = [0, 0], sizes = [1, 128], strides = [1, 1]} : vector<1x256xf32> to vector<1x128xf32>
    %cst_18 = arith.constant dense<0.000000e+00> : vector<1xf32>
    %24 = vector.multi_reduction <add>, %23, %cst_18 [1] : vector<1x128xf32> to vector<1xf32>
    %25 = vector.shape_cast %24 : vector<1xf32> to vector<1x1xf32>
    %cst_19 = arith.constant 1.280000e+02 : f32
    %26 = vector.broadcast %cst_19 : f32 to vector<1x1xf32>
    %27 = arith.divf %25, %26 : vector<1x1xf32>
    %28 = vector.broadcast %27 : vector<1x1xf32> to vector<1x128xf32>
    %29 = arith.subf %23, %28 : vector<1x128xf32>
    %30 = arith.mulf %29, %29 : vector<1x128xf32>
    %cst_20 = arith.constant dense<0.000000e+00> : vector<1xf32>
    %31 = vector.multi_reduction <add>, %30, %cst_20 [1] : vector<1x128xf32> to vector<1xf32>
    %32 = vector.shape_cast %31 : vector<1xf32> to vector<1x1xf32>
    %cst_21 = arith.constant 1.280000e+02 : f32
    %33 = vector.broadcast %cst_21 : f32 to vector<1x1xf32>
    %34 = arith.divf %32, %33 : vector<1x1xf32>
    %35 = vector.broadcast %27 : vector<1x1xf32> to vector<1x128xf32>
    %36 = arith.subf %23, %35 : vector<1x128xf32>
    %cst_22 = arith.constant 9.99999974E-6 : f32
    %37 = vector.broadcast %cst_22 : f32 to vector<1x1xf32>
    %38 = arith.addf %34, %37 : vector<1x1xf32>
    %39 = math.rsqrt %38 : vector<1x1xf32>
    %40 = vector.broadcast %39 : vector<1x1xf32> to vector<1x128xf32>
    %41 = arith.mulf %36, %40 : vector<1x128xf32>
    %cst_23 = arith.constant 0.000000e+00 : f32
    %42 = vector.broadcast %cst_23 : f32 to vector<1x128xf32>
    %43 = arith.maximumf %41, %42 : vector<1x128xf32>
    %44 = vector.extract_strided_slice %22 {offsets = [0, 128], sizes = [1, 128], strides = [1, 1]} : vector<1x256xf32> to vector<1x128xf32>
    %cst_24 = arith.constant dense<0.000000e+00> : vector<1xf32>
    %45 = vector.multi_reduction <add>, %44, %cst_24 [1] : vector<1x128xf32> to vector<1xf32>
    %46 = vector.shape_cast %45 : vector<1xf32> to vector<1x1xf32>
    %cst_25 = arith.constant 1.280000e+02 : f32
    %47 = vector.broadcast %cst_25 : f32 to vector<1x1xf32>
    %48 = arith.divf %46, %47 : vector<1x1xf32>
    %49 = vector.broadcast %48 : vector<1x1xf32> to vector<1x128xf32>
    %50 = arith.subf %44, %49 : vector<1x128xf32>
    %51 = arith.mulf %50, %50 : vector<1x128xf32>
    %cst_26 = arith.constant dense<0.000000e+00> : vector<1xf32>
    %52 = vector.multi_reduction <add>, %51, %cst_26 [1] : vector<1x128xf32> to vector<1xf32>
    %53 = vector.shape_cast %52 : vector<1xf32> to vector<1x1xf32>
    %cst_27 = arith.constant 1.280000e+02 : f32
    %54 = vector.broadcast %cst_27 : f32 to vector<1x1xf32>
    %55 = arith.divf %53, %54 : vector<1x1xf32>
    %56 = vector.broadcast %48 : vector<1x1xf32> to vector<1x128xf32>
    %57 = arith.subf %44, %56 : vector<1x128xf32>
    %cst_28 = arith.constant 9.99999974E-6 : f32
    %58 = vector.broadcast %cst_28 : f32 to vector<1x1xf32>
    %59 = arith.addf %55, %58 : vector<1x1xf32>
    %60 = math.rsqrt %59 : vector<1x1xf32>
    %61 = vector.broadcast %60 : vector<1x1xf32> to vector<1x128xf32>
    %62 = arith.mulf %57, %61 : vector<1x128xf32>
    %cst_29 = arith.constant 0.000000e+00 : f32
    %63 = vector.broadcast %cst_29 : f32 to vector<1x128xf32>
    %64 = arith.maximumf %62, %63 : vector<1x128xf32>
    %65 = tpu.concatenate %43, %64 in 1 : vector<1x128xf32>, vector<1x128xf32> -> vector<1x256xf32>
    %cst_30 = arith.constant dense<0.000000e+00> : vector<1x256xf32>
    %66 = tpu.matmul %65, %19, %cst_30 {dimension_numbers = #tpu.dot_dimension_numbers<[1], [0], [0], [1], [0, 0, 1, 1], [], []>} : vector<1x256xf32>, vector<256x256xf32>, vector<1x256xf32> -> vector<1x256xf32>
    %67 = arith.addf %66, %20 : vector<1x256xf32>
    %68 = vector.extract_strided_slice %67 {offsets = [0, 0], sizes = [1, 128], strides = [1, 1]} : vector<1x256xf32> to vector<1x128xf32>
    %cst_31 = arith.constant 0.000000e+00 : f32
    %69 = vector.broadcast %cst_31 : f32 to vector<1x128xf32>
    %70 = arith.subf %69, %68 : vector<1x128xf32>
    %71 = math.exp %70 : vector<1x128xf32>
    %cst_32 = arith.constant 1.000000e+00 : f32
    %72 = vector.broadcast %cst_32 : f32 to vector<1x128xf32>
    %73 = arith.addf %72, %71 : vector<1x128xf32>
    %cst_33 = arith.constant 1.000000e+00 : f32
    %74 = vector.broadcast %cst_33 : f32 to vector<1x128xf32>
    %75 = arith.divf %74, %73 : vector<1x128xf32>
    %76 = vector.extract_strided_slice %67 {offsets = [0, 128], sizes = [1, 128], strides = [1, 1]} : vector<1x256xf32> to vector<1x128xf32>
    %77 = vector.broadcast %75 : vector<1x128xf32> to vector<256x128xf32>
    %78 = arith.mulf %1, %77 : vector<256x128xf32>
    %79 = vector.broadcast %76 : vector<1x128xf32> to vector<256x128xf32>
    %80 = arith.addf %78, %79 : vector<256x128xf32>
    %c0_34 = arith.constant 0 : index
    %c0_35 = arith.constant 0 : index
    %c0_36 = arith.constant 0 : index
    %81 = vector.load %arg8[%c0_34, %c0_35, %c0_36] : memref<1x256x128xf32, #tpu.memory_space<vmem>>, vector<1x256x128xf32>
    %82 = vector.shape_cast %81 : vector<1x256x128xf32> to vector<256x128xf32>
    %83 = vector.shape_cast %80 : vector<256x128xf32> to vector<1x256x128xf32>
    tpu.vector_store %arg8[%c0_34, %c0_35, %c0_36], %83 {strides = array<i32>} : memref<1x256x128xf32, #tpu.memory_space<vmem>>, vector<1x256x128xf32>,
    return
  }
  func.func @transform_0(%arg0: i32) -> (i32, i32, i32) {
    %c0_i32 = arith.constant 0 : i32
    %c0_i32_0 = arith.constant 0 : i32
    %c0_i32_1 = arith.constant 0 : i32
    return %arg0, %c0_i32, %c0_i32_0 : i32, i32, i32
  }
  func.func @transform_1(%arg0: i32) -> (i32, i32) {
    %c0_i32 = arith.constant 0 : i32
    %c0_i32_0 = arith.constant 0 : i32
    %c0_i32_1 = arith.constant 0 : i32
    return %c0_i32, %c0_i32_0 : i32, i32
  }
  func.func @transform_2(%arg0: i32) -> (i32, i32) {
    %c0_i32 = arith.constant 0 : i32
    %c0_i32_0 = arith.constant 0 : i32
    %c0_i32_1 = arith.constant 0 : i32
    return %c0_i32, %c0_i32_0 : i32, i32
  }
  func.func @transform_3(%arg0: i32) -> (i32, i32) {
    %c0_i32 = arith.constant 0 : i32
    %c0_i32_0 = arith.constant 0 : i32
    %c0_i32_1 = arith.constant 0 : i32
    return %c0_i32, %c0_i32_0 : i32, i32
  }
  func.func @transform_4(%arg0: i32) -> (i32, i32) {
    %c0_i32 = arith.constant 0 : i32
    %c0_i32_0 = arith.constant 0 : i32
    %c0_i32_1 = arith.constant 0 : i32
    return %c0_i32, %c0_i32_0 : i32, i32
  }
  func.func @transform_5(%arg0: i32) -> (i32, i32) {
    %c0_i32 = arith.constant 0 : i32
    %c0_i32_0 = arith.constant 0 : i32
    %c0_i32_1 = arith.constant 0 : i32
    return %c0_i32, %c0_i32_0 : i32, i32
  }
  func.func @transform_6(%arg0: i32) -> (i32, i32) {
    %c0_i32 = arith.constant 0 : i32
    %c0_i32_0 = arith.constant 0 : i32
    %c0_i32_1 = arith.constant 0 : i32
    return %c0_i32, %c0_i32_0 : i32, i32
  }
  func.func @transform_7(%arg0: i32) -> (i32, i32, i32) {
    %c0_i32 = arith.constant 0 : i32
    %c0_i32_0 = arith.constant 0 : i32
    %c0_i32_1 = arith.constant 0 : i32
    return %arg0, %c0_i32, %c0_i32_0 : i32, i32, i32
  }
}

</mosaic_0001>

<bundles_post_ra>
// kernel: global_context_block.1
= control target key start
LH: loop header
LB: loop body
LE: loop exit
PB: predicated region body
PF: predicated region fallthrough
CT: control target
= control target key end

     0   :  { %s1931_s0 = inlined_call_operand.hbm [shape: f32[2,256,128], index: 0, kind: input, shape index: {}]   ;;  %s1932_s1 = inlined_call_operand.vmem [shape: f32[1,128], index: 1, kind: input, shape index: {}]   ;;  %s1933_s2 = inlined_call_operand.<no memory space> [shape: f32[1,1], index: 2, kind: input, shape index: {}]   ;;  %s1934_s3 = inlined_call_operand.hbm [shape: f32[128,256], index: 3, kind: input, shape index: {}]   ;;  %s1935_s4 = inlined_call_operand.vmem [shape: f32[1,256], index: 4, kind: input, shape index: {}]   ;;  %s1936_s5 = inlined_call_operand.hbm [shape: f32[256,256], index: 5, kind: input, shape index: {}]   ;;  %s1937_s6 = inlined_call_operand.vmem [shape: f32[1,256], index: 6, kind: input, shape index: {}]   ;;  %s1938_s7 = inlined_call_operand.hbm [shape: f32[2,256,128], index: 7, kind: output, shape index: {}]  }
   0x1   :  { %v12_v0 = vstv %s1933_s2 }
   0x2   :  { %13 = vst [vmem:[#allocation2] sm:$0x1] %v12_v0 }
   0x3   :  { %14 = vsyncpa [#allocation4], 0 }
   0x4   :  { %16 = vsyncpa [#allocation4 + $0x1], 0 }
   0x5   :  { %17 = vsyncpa [#allocation7], 0 }
   0x6   :  { %18 = vsyncpa [#allocation5], 0 }
   0x7   :  { %20 = vsyncpa [#allocation5 + $0x1], 0  ;;  %s1422_s26 = smov 0   ;;  %s1424_s27 = smov 0  }
   0x8   :  { %s1426_s28 = smov 0   ;;  %s1428_s29 = smov 0  }
   0x9 LB: > { %s1443_s2 = sadd.s32 4294967295, %s1365_s29   ;;  %s1038_s30 = sadd.s32 4294967294, %s1365_s29   ;;  %s1365_s29 = sphi %s1428_s29, %s1960_s29   ;;  %s1361_s28 = sphi %s1426_s28, %s1959_s28   ;;  %s1357_s27 = sphi %s1424_s27, %s1958_s27   ;;  %s1353_s26 = sphi %s1422_s26, %s1957_s26  }
   0xa   : > { %p46_p0 = scmp.ne.s32.totalorder %s1357_s27, %s1353_s26  ;;  %p1939_p1 = scmp.eq.s32.totalorder %s1443_s2, 0 }
   0xb   : > { %p202_p3 = scmp.eq.s32.totalorder %s1038_s30, 1  ;;  %p1039_p5 = scmp.ge.s32.totalorder %s1365_s29, 1 }
   0xc   : > { %p1452_p4 = por %p1939_p1, %p46_p0  ;;  %p209_p7 = scmp.lt.s32.totalorder %s1365_s29, 3 }
   0xd   : > { %p1457_p6 = por %p202_p3, %p46_p0  ;;  %s1367_s11 = smov [#allocation6]  }
   0xe   : > { %s1943_s8 = scalar_select %p1452_p4, 1, 0 }
   0xf   : > { %s1944_s9 = scalar_select %p1457_p6, 1, 0 }
  0x10   : > { %p1462_p8 = pnand %p1039_p5, %p209_p7  ;;  %s227_s12 = sshll.u32 %s1367_s11, 4  ;;  %s228_s12 = int_to_ptr.vmem [resolvable:$true] %s227_s12 }
  0x11   : > { %s1368_s14 = smov [#allocation8]   ;;  %s1228_s16 = scalar_lea.vmem %s228_s12, 4096 }
  0x12   : > { %s1945_s10 = scalar_select %p1462_p8, 1, 0 }
  0x13   : > { %p1139_p9 = pneg %p1462_p8  ;;  %s243_s15 = sshll.u32 %s1368_s14, 4  ;;  %s244_s15 = int_to_ptr.vmem [resolvable:$true] %s243_s15 }
  0x14   : > { %p1229_p13 = scmp.ne.s32.totalorder %s228_s12, %s1228_s16  ;;  %p1236_p5 = scmp.lt.s32.totalorder %s228_s12, %s228_s12 }
  0x15   : > { %p1471_p11 = pnand %p1139_p9, %p1939_p1  ;;  %p1237_p7 = scmp.lt.s32.totalorder %s1228_s16, %s1228_s16 }
  0x17   : > { %p1219_p12 = pneg %p1471_p11  ;;  %p1238_p10 = por %p1237_p7, %p1236_p5 }
  0x19   : > { %p1231_p0 = pnand %p1229_p13, %p1219_p12 }
  0x1b   : > { %p1232_p3 = pneg %p1231_p0 }
  0x1d   : > { %p1239_p9 = pnand %p1238_p10, %p1232_p3 }
  0x1f   : > { %1242 = shalt.err (!%p1239_p9)
}
  0x20   : > { %s1369_s17 = smov 256   ;;  %s1370_s18 = smov 16  }
  0x21   : > { %1142 = dma.hbm_to_vmem [thread:$0]  (!%p1471_p11), %s1934_s3, 4096, %s228_s12, [#allocation7], %s1369_s17, %s1369_s17, %s1370_s18  }
  0x22   : > { %s1254_s21 = scalar_lea.vmem %s244_s15, 8192  ;;  %p1262_p2 = scmp.lt.s32.totalorder %s244_s15, %s244_s15 }
  0x23   : > { %p1255_p1 = scmp.ne.s32.totalorder %s244_s15, %s1254_s21  ;;  %p1263_p6 = scmp.lt.s32.totalorder %s1254_s21, %s1254_s21 }
  0x25   : > { %p1257_p13 = pnand %p1255_p1, %p1219_p12  ;;  %p1264_p5 = por %p1263_p6, %p1262_p2 }
  0x27   : > { %p1258_p0 = pneg %p1257_p13 }
  0x29   : > { %p1265_p10 = pnand %p1264_p5, %p1258_p0 }
  0x2b   : > { %1268 = shalt.err (!%p1265_p10)
}
  0x2c   : > { %1145 = dma.hbm_to_vmem [thread:$0]  (!%p1471_p11), %s1936_s5, 8192, %s244_s15, [#allocation7], %s1369_s17, %s1369_s17, %s1370_s18  }
  0x2d   : > { %s1494_s24 = sadd.s32 1, %s1365_s29   ;;  %s33_s25 = sadd.s32 1, %s1361_s28 }
  0x2e   : > { %s30_s30 = ssub.s32 %s1365_s29, %s1494_s24  ;;  %p40_p1 = scmp.ne.s32.totalorder %s1361_s28, %s1357_s27 }
  0x2f   : > { %p31_p2 = scmp.eq.s32.totalorder %s30_s30, 0  ;;  %p41_p6 = scmp.eq.s32.totalorder %s1365_s29, 0 }
  0x30   : > { %p1947_p12 = scmp.eq.s32.totalorder %s1443_s2, 1  ;;  %p1156_p7 = scmp.lt.s32.totalorder %s1365_s29, 2 }
  0x31   : > { %s1510_s12 = scalar_select %p31_p2, %s1361_s28, %s33_s25  }
  0x32   : > { %p1504_p3 = por %p1947_p12, %p40_p1  ;;  %p42_p9 = por %p41_p6, %p40_p1 }
  0x33   : > { %s260_s13 = sand.u32 1, %s1361_s28   ;;  %s1056_s15 = sshll.u32 %s1365_s29, 12 }
  0x34   : > { %s1948_s11 = scalar_select %p1504_p3, 1, 0 }
  0x35   : > { %s1043_s14 = sshll.u32 %s260_s13, 8  ;;  %s1517_s18 = scalar_lea.hbm %s1931_s0, %s1056_s15 }
  0x36   : > { %s264_s19 = scalar_lea.vmem [#allocation3], %s1043_s14  ;;  %p1521_p11 = pnand %p1156_p7, %p42_p9 }
  0x37   : > { %s271_s20 = sshll.u32 %s264_s19, 4  ;;  %s1525_s22 = scalar_lea.sflag [#allocation4], %s260_s13  ;;  %s1519_s20 = int_to_ptr.vmem [resolvable:$true] %s271_s20 }
  0x38   : > { %s1269_s23 = scalar_lea.hbm %s1517_s18, 4096  ;;  %p1271_p0 = pneg %p1521_p11 }
  0x39   : > { %p1270_p13 = scmp.ne.s32.totalorder %s1517_s18, %s1269_s23  ;;  %s1274_s14 = scalar_lea.hbm %s1931_s0, 8192 }
  0x3a   : > { %p1275_p1 = scmp.lt.s32.totalorder %s1517_s18, %s1931_s0  ;;  %p1276_p2 = scmp.lt.s32.totalorder %s1274_s14, %s1269_s23 }
  0x3b   : > { %p1272_p5 = pnand %p1271_p0, %p1270_p13 }
  0x3c   : > { %p1277_p6 = por %p1276_p2, %p1275_p1 }
  0x3d   : > { %p1273_p10 = pneg %p1272_p5 }
  0x3f   : > { %p1278_p12 = pnand %p1277_p6, %p1273_p10 }
  0x41   : > { %1281 = shalt.err (!%p1278_p12)
}
  0x42   : > { %s1282_s13 = scalar_lea.vmem %s1519_s20, 4096  ;;  %s1371_s17 = smov [#allocation3]  }
  0x43   : > { %p1283_p7 = scmp.ne.s32.totalorder %s1519_s20, %s1282_s13  ;;  %s1287_s19 = sshll.u32 %s1371_s17, 4  ;;  %s1288_s19 = int_to_ptr.vmem [resolvable:$false] %s1287_s19 }
  0x44   : > { %s1289_s25 = scalar_lea.vmem %s1288_s19, 8192  ;;  %p1290_p5 = scmp.lt.s32.totalorder %s1519_s20, %s1288_s19 }
  0x45   : > { %p1285_p9 = pnand %p1283_p7, %p1271_p0  ;;  %p1291_p3 = scmp.lt.s32.totalorder %s1289_s25, %s1282_s13 }
  0x47   : > { %p1286_p13 = pneg %p1285_p9  ;;  %p1292_p4 = por %p1291_p3, %p1290_p5 }
  0x49   : > { %p1293_p8 = pnand %p1292_p4, %p1286_p13 }
  0x4b   : > { %1296 = shalt.err (!%p1293_p8)
}
  0x4c   : > { %s1372_s23 = smov 128   ;;  %s1373_s30 = smov 8  }
  0x4d   : > { %1149 = dma.hbm_to_vmem [thread:$0]  (!%p1521_p11), %s1517_s18, 4096, %s1519_s20, %s1525_s22, %s1372_s23, %s1372_s23, %s1373_s30  }
  0x4e   : > { %p1950_p0 = scmp.ne.s32.totalorder %s1945_s10, 0 }
  0x4f   : > { %s1549_s14 = sand.u32 (!%p1950_p0), 1, %s1357_s27   ;;  %p1951_p4 = scmp.ne.s32.totalorder (!%p1950_p0), %s1943_s8, 0 }
  0x50   : > { %283 = sbr.rel (%p1950_p0) target bundleno = 1489 (0x5d1), region = 48  ;;  %s1047_s15 = sshll.u32 (!%p1950_p0), %s1549_s14, 8 }
  0x51   : > { %s286_s16 = scalar_lea.sflag (!%p1950_p0), [#allocation4], %s1549_s14  ;;  %s1555_s13 = scalar_lea.vmem (!%p1950_p0), [#allocation3], %s1047_s15 }
  0x55   : > { %1340 = dma.done.wait (%p1951_p4), %s286_s16, 4096  }
  0x56   : > { %1342 = vsyncadd (%p1951_p4), %s286_s16, 4294963200  ;;  %p1952_p8 = scmp.eq.s32.totalorder %s1443_s2, 0 }
  0x58   : > { %1344 = dma.done.wait (%p1952_p8), [#allocation7], 12288   ;;  %p1953_p3 = pmov %p1952_p8 }
  0x59   : > { %v1374_v1 = vmov 0   ;;  %v1566_v2 = vld [vmem:[%s1555_s13 + $0xf8] sm:$0xff]  ;;  %v1572_v4 = vld [vmem:[%s1555_s13 + $0xf0] sm:$0xff]  ;;  %v1584_v6 = vld [vmem:[%s1555_s13 + $0xe8] sm:$0xff]  ;;  %v367_v36 = vlaneseq  ;;  %vm442_vm0 = vcmask 1040384   ;;  %s1827_s17 = scalar_lea.vmem [#allocation9], %s1047_s15 }
  0x5a   : > { %1346 = vsyncadd (%p1953_p3), [#allocation7], 4294955008  ;;  %1202 = vset.pattern.permute.xlu0 %v1374_v1  ;;  %v1569_v3 = vld [vmem:[%s1555_s13 + $0x78] sm:$0xff]  ;;  %1058 = vmatprep.subr.mxu0 %v1566_v2  ;;  %v1580_v5 = vld [vmem:[%s1555_s13 + $0x70] sm:$0xff]  ;;  %s1057_s19 = sshll.u32 %s1443_s2, 12  ;;  %s946_s25 = sshll.u32 %s1827_s17, 4  ;;  %s1872_s25 = int_to_ptr.vmem [resolvable:$true] %s946_s25 }
  0x5b   : > { %1092 = vmatprep.subr.mxu1 %v1566_v2  ;;  %1059 = vmatpush3.xpose.msra.mxu0 %v1569_v3  ;;  %v1588_v7 = vld [vmem:[%s1555_s13 + $0x68] sm:$0xff]  ;;  %v1593_v8 = vld [vmem:[%s1555_s13 + $0xe0] sm:$0xff]  ;;  %v1602_v10 = vld [vmem:[%s1555_s13 + $0xd8] sm:$0xff]  ;;  %v1732_v37 = vshrl.u32 %v367_v36, 7  ;;  %s1870_s30 = scalar_lea.hbm %s1938_s7, %s1057_s19  ;;  %s933_s15 = scalar_lea.sflag [#allocation5], %s1549_s14 }
  0x5c   : > { %1093 = vmatpush3.msra.mxu1 %v1569_v3  ;;  %1060 = vmatprep.subr.mxu0 %v1572_v4  ;;  %v1598_v9 = vld [vmem:[%s1555_s13 + $0x60] sm:$0xff]  ;;  %v1606_v11 = vld [vmem:[%s1555_s13 + $0x58] sm:$0xff]  ;;  %v1618_v13 = vld [vmem:[%s1555_s13 + $0xd0] sm:$0xff]  ;;  %s1297_s16 = scalar_lea.vmem %s1872_s25, 4096  ;;  %p1954_p10 = scmp.ne.s32.totalorder %s1948_s11, 0 }
  0x5d   : > { %1094 = vmatprep.subr.mxu1 %v1572_v4  ;;  %v1613_v12 = vld [vmem:[%s1932_s1] sm:$0x1]  ;;  %v1622_v15 = vld [vmem:[%s1555_s13 + $0x50] sm:$0xff]  ;;  %v1626_v16 = vld [vmem:[%s1555_s13 + $0xc8] sm:$0xff]  ;;  %v1735_v38 = vsub.s32 0, %v1732_v37  ;;  %p1298_p11 = scmp.ne.s32.totalorder %s1872_s25, %s1297_s16 }
  0x5e   : > { %1095 = vmatpush3.msra.mxu1 %v1580_v5  ;;  %1090 = vmatprep.mubr.f32.mxu0 %v1613_v12  ;;  %v361_v14 = vld [vmem:[#allocation2] sm:$0x1]  ;;  %v1631_v17 = vld [vmem:[%s1555_s13 + $0x48] sm:$0xff]  ;;  %v1636_v18 = vld [vmem:[%s1555_s13 + $0xc0] sm:$0xff] }
  0x5f   : > { %1096 = vmatprep.subr.mxu1 %v1584_v6  ;;  %1061 = vmatpush3.xpose.msra.mxu0 %v1580_v5  ;;  %v1640_v19 = vld [vmem:[%s1555_s13 + $0x40] sm:$0xff]  ;;  %v1644_v20 = vld [vmem:[%s1555_s13 + $0xb8] sm:$0xff]  ;;  %v1654_v22 = vld [vmem:[%s1555_s13 + $0xb0] sm:$0xff]  ;;  %p1299_p1 = pnand %p1298_p11, %p1954_p10 }
  0x60   : > { %1097 = vmatpush3.msra.mxu1 %v1588_v7  ;;  %1062 = vmatprep.subr.mxu0 %v1584_v6  ;;  %v1649_v21 = vld [vmem:[%s1555_s13 + $0x38] sm:$0xff]  ;;  %v1658_v23 = vld [vmem:[%s1555_s13 + $0x30] sm:$0xff]  ;;  %v1662_v24 = vld [vmem:[%s1555_s13 + $0xa8] sm:$0xff] }
  0x61   : > { %1098 = vmatprep.subr.mxu1 %v1593_v8  ;;  %364 = vperm.xlu0 %1202, %v361_v14   ;;  %v1667_v25 = vld [vmem:[%s1555_s13 + $0x28] sm:$0xff]  ;;  %v1672_v26 = vld [vmem:[%s1555_s13 + $0xa0] sm:$0xff]  ;;  %v1680_v28 = vld [vmem:[%s1555_s13 + $0x98] sm:$0xff]  ;;  %p1300_p2 = pneg %p1299_p1 }
  0x62   : > { %1099 = vmatpush3.msra.mxu1 %v1598_v9  ;;  %v1676_v27 = vld [vmem:[%s1555_s13 + $0x20] sm:$0xff]  ;;  %v1685_v29 = vld [vmem:[%s1555_s13 + $0x18] sm:$0xff]  ;;  %v1690_v30 = vld [vmem:[%s1555_s13 + $0x90] sm:$0xff] }
  0x63   : > { %1100 = vmatprep.subr.mxu1 %v1602_v10  ;;  %1063 = vmatpush3.xpose.msra.mxu0 %v1588_v7  ;;  %v1694_v31 = vld [vmem:[%s1555_s13 + $0x10] sm:$0xff]  ;;  %v1698_v32 = vld [vmem:[%s1555_s13 + $0x88] sm:$0xff]  ;;  %v1708_v34 = vld [vmem:[%s1555_s13 + $0x80] sm:$0xff] }
  0x64   : > { %1101 = vmatpush3.msra.mxu1 %v1606_v11  ;;  %1064 = vmatprep.subr.mxu0 %v1593_v8  ;;  %v1703_v33 = vld [vmem:[%s1555_s13 + $0x8] sm:$0xff]  ;;  %v1712_v35 = vld [vmem:[%s1555_s13] sm:$0xff]  ;;  %v562_v58 = vld [vmem:[#allocation6 + $0xf8] sm:$0xff]  ;;  %s1376_s13 = smov [#allocation9]  }
  0x65   : > { %1102 = vmatprep.subr.mxu1 %v1618_v13  ;;  %v561_v59 = vld [vmem:[#allocation6 + $0xf0] sm:$0xff]  ;;  %v560_v60 = vld [vmem:[#allocation6 + $0xe8] sm:$0xff]  ;;  %v559_v61 = vld [vmem:[#allocation6 + $0xe0] sm:$0xff]  ;;  %s1301_s8 = sshll.u32 %s1376_s13, 4  ;;  %s1302_s8 = int_to_ptr.vmem [resolvable:$false] %s1301_s8 }
  0x66   : > { %1103 = vmatpush3.msra.mxu1 %v1622_v15  ;;  %v558_v62 = vld [vmem:[#allocation6 + $0xd8] sm:$0xff]  ;;  %v557_v63 = vld [vmem:[#allocation6 + $0xd0] sm:$0xff]  ;;  %v556_v0 = vld [vmem:[#allocation6 + $0xc8] sm:$0xff]  ;;  %s1303_s10 = scalar_lea.vmem %s1302_s8, 8192  ;;  %p1304_p6 = scmp.lt.s32.totalorder %s1872_s25, %s1302_s8 }
  0x67   : > { %1065 = vmatpush3.xpose.msra.mxu0 %v1598_v9  ;;  %1104 = vmatprep.subr.mxu1 %v1626_v16  ;;  %v555_v1 = vld [vmem:[#allocation6 + $0xc0] sm:$0xff]  ;;  %v553_v14 = vld [vmem:[#allocation6 + $0xb0] sm:$0xff]  ;;  %v552_v36 = vld [vmem:[#allocation6 + $0xa8] sm:$0xff]  ;;  %p1305_p12 = scmp.lt.s32.totalorder %s1303_s10, %s1297_s16 }
  0x68   : > { %1066 = vmatprep.subr.mxu0 %v1602_v10  ;;  %1105 = vmatpush3.msra.mxu1 %v1631_v17 }
  0x69   : > { %1106 = vmatprep.subr.mxu1 %v1636_v18  ;;  %p1306_p7 = por %p1305_p12, %p1304_p6 }
  0x6a   : > { %1107 = vmatpush3.msra.mxu1 %v1640_v19 }
  0x6b   : > { %1067 = vmatpush3.xpose.msra.mxu0 %v1606_v11  ;;  %1108 = vmatprep.subr.mxu1 %v1644_v20  ;;  %p1307_p9 = pnand %p1306_p7, %p1300_p2 }
  0x6c   : > { %1068 = vmatprep.subr.mxu0 %v1618_v13  ;;  %1109 = vmatpush3.msra.mxu1 %v1649_v21 }
  0x6d   : > { %1110 = vmatprep.subr.mxu1 %v1654_v22 }
  0x6e   : > { %1111 = vmatpush3.msra.mxu1 %v1658_v23 }
  0x6f   : > { %1069 = vmatpush3.xpose.msra.mxu0 %v1622_v15  ;;  %1112 = vmatprep.subr.mxu1 %v1662_v24 }
  0x70   : > { %1070 = vmatprep.subr.mxu0 %v1626_v16  ;;  %1113 = vmatpush3.msra.mxu1 %v1667_v25 }
  0x71   : > { %1114 = vmatprep.subr.mxu1 %v1672_v26 }
  0x72   : > { %1115 = vmatpush3.msra.mxu1 %v1676_v27 }
  0x73   : > { %1071 = vmatpush3.xpose.msra.mxu0 %v1631_v17  ;;  %1116 = vmatprep.subr.mxu1 %v1680_v28 }
  0x74   : > { %1072 = vmatprep.subr.mxu0 %v1636_v18  ;;  %1117 = vmatpush3.msra.mxu1 %v1685_v29 }
  0x75   : > { %1118 = vmatprep.subr.mxu1 %v1690_v30 }
  0x76   : > { %1119 = vmatpush3.msra.mxu1 %v1694_v31 }
  0x77   : > { %1073 = vmatpush3.xpose.msra.mxu0 %v1640_v19  ;;  %1120 = vmatprep.subr.mxu1 %v1698_v32 }
  0x78   : > { %1074 = vmatprep.subr.mxu0 %v1644_v20  ;;  %1121 = vmatpush3.msra.mxu1 %v1703_v33 }
  0x79   : > { %1122 = vmatprep.subr.mxu1 %v1708_v34 }
  0x7a   : > { %1123 = vmatpush3.msra.mxu1 %v1712_v35 }
  0x7b   : > { %1075 = vmatpush3.xpose.msra.mxu0 %v1649_v21  ;;  %640 = vmatprep.subr.mxu1 %v562_v58  ;;  %v532_v58 = vld [vmem:[#allocation6 + $0x8] sm:$0xff] }
  0x7c   : > { %1076 = vmatprep.subr.mxu0 %v1654_v22 }
  0x7f   : > { %1077 = vmatpush3.xpose.msra.mxu0 %v1658_v23 }
  0x80   : > { %1078 = vmatprep.subr.mxu0 %v1662_v24 }
  0x83   : > { %1079 = vmatpush3.xpose.msra.mxu0 %v1667_v25 }
  0x84   : > { %1080 = vmatprep.subr.mxu0 %v1672_v26 }
  0x87   : > { %1081 = vmatpush3.xpose.msra.mxu0 %v1676_v27 }
  0x88   : > { %1082 = vmatprep.subr.mxu0 %v1680_v28 }
  0x8b   : > { %1083 = vmatpush3.xpose.msra.mxu0 %v1685_v29 }
  0x8c   : > { %1084 = vmatprep.subr.mxu0 %v1690_v30 }
  0x8f   : > { %1085 = vmatpush3.xpose.msra.mxu0 %v1694_v31 }
  0x90   : > { %1086 = vmatprep.subr.mxu0 %v1698_v32 }
  0x93   : > { %1087 = vmatpush3.xpose.msra.mxu0 %v1703_v33 }
  0x94   : > { %1088 = vmatprep.subr.mxu0 %v1708_v34 }
  0x97   : > { %1089 = vmatpush3.xpose.msra.mxu0 %v1712_v35 }
  0x9a   : > { %1091 = vmatmul.mubr.f32.vlgmr.msra.gmra.mxu0 %v1613_v12  ;;  %v554_v12 = vld [vmem:[#allocation6 + $0xb8] sm:$0xff] }
  0xdc   : > { %v365_v39 = vpop.permute.xlu0 %364 }
  0xdd   : > { %v370_v40 = vrot.slane %v365_v39, %v1735_v38  ;;  %v551_v39 = vld [vmem:[#allocation6 + $0xa0] sm:$0xff] }
 0x15a   : > { %v437_v41 = vpop.f32.mrf.mxu0 }
 0x15b   : > { %v438_v42 = vadd.f32 %v437_v41, %v370_v40  ;;  %v549_v41 = vld [vmem:[#allocation6 + $0x90] sm:$0xff] }
 0x15c   : > { %v439_v43 = vpop.f32.mrf.mxu0 }
 0x15d   : > { %v440_v44 = vadd.f32 %v439_v43, %v370_v40  ;;  %v443_v45 = vsel %vm442_vm0, %v438_v42, -inf  ;;  %v550_v40 = vld [vmem:[#allocation6 + $0x98] sm:$0xff]  ;;  %v547_v43 = vld [vmem:[#allocation6 + $0x80] sm:$0xff] }
 0x15f   : > { %v444_v46 = vsel %vm442_vm0, %v440_v44, -inf }
 0x160   : > { %v445_v47 = vmax.f32 %v443_v45, %v444_v46  ;;  %v545_v45 = vld [vmem:[#allocation6 + $0x70] sm:$0xff]  ;;  %v544_v46 = vld [vmem:[#allocation6 + $0x68] sm:$0xff] }
 0x162   : > { %446 = vmax.xlane.f32.xlu0 %v445_v47  ;;  %v543_v47 = vld [vmem:[#allocation6 + $0x60] sm:$0xff] }
 0x1eb   : > { %v447_v48 = vpop.xlane.xlu0 %446 }
 0x1ec   : > { %v448_v49 = vsub.f32 %v438_v42, %v447_v48  ;;  %v449_v50 = vsub.f32 %v440_v44, %v447_v48  ;;  %v548_v42 = vld [vmem:[#allocation6 + $0x88] sm:$0xff]  ;;  %v546_v44 = vld [vmem:[#allocation6 + $0x78] sm:$0xff] }
 0x1ed   : > { %v542_v48 = vld [vmem:[#allocation6 + $0x58] sm:$0xff] }
 0x1ee   : > { %v450_v51 = vmul.f32 1.442695, %v448_v49  ;;  %v452_v52 = vmul.f32 1.442695, %v449_v50  ;;  %v541_v49 = vld [vmem:[#allocation6 + $0x50] sm:$0xff]  ;;  %v540_v50 = vld [vmem:[#allocation6 + $0x48] sm:$0xff] }
 0x1f0   : > { %1203 = vpow2.f32 %v450_v51  ;;  %v539_v51 = vld [vmem:[#allocation6 + $0x40] sm:$0xff] }
 0x1f1   : > { %1205 = vpow2.f32 %v452_v52  ;;  %v538_v52 = vld [vmem:[#allocation6 + $0x38] sm:$0xff] }
 0x1fd   : > { %v1204_v53 = vpop.eup %1203 }
 0x1fe   : > { %v1206_v54 = vpop.eup %1205  ;;  %v454_v55 = vsel %vm442_vm0, %v1204_v53, 0.0 }
 0x1ff   : > { %523 = vmatprep.mubr.f32.mxu1 %v1206_v54  ;;  %v455_v56 = vsel %vm442_vm0, %v1206_v54, 0.0  ;;  %v536_v54 = vld [vmem:[#allocation6 + $0x28] sm:$0xff] }
 0x200   : > { %524 = vmatmul.mubr.f32.vlgmr.msra.gmra.mxu1 %v1204_v53  ;;  %v456_v57 = vadd.f32 %v455_v56, %v454_v55  ;;  %v537_v53 = vld [vmem:[#allocation6 + $0x30] sm:$0xff]  ;;  %v535_v55 = vld [vmem:[#allocation6 + $0x20] sm:$0xff]  ;;  %v534_v56 = vld [vmem:[#allocation6 + $0x18] sm:$0xff] }
 0x201   : > { %641 = vmatpush1.msra.mxu1 %v561_v59  ;;  %v531_v59 = vld [vmem:[#allocation6] sm:$0xff] }
 0x202   : > { %457 = vadd.xlane.f32.xlu1 %v456_v57  ;;  %642 = vmatprep.subr.mxu1 %v560_v60  ;;  %v533_v57 = vld [vmem:[#allocation6 + $0x10] sm:$0xff]  ;;  %v1375_v60 = vmov 0.0  }
 0x203   : > { %643 = vmatpush1.msra.mxu1 %v559_v61  ;;  %704 = vmatprep.mubr.f32.mxu1 %v1375_v60  ;;  %v582_v60 = vld [vmem:[#allocation8 + $0x90] sm:$0xff] }
 0x204   : > { %644 = vmatprep.subr.mxu1 %v558_v62 }
 0x205   : > { %645 = vmatpush1.msra.mxu1 %v557_v63 }
 0x206   : > { %646 = vmatprep.subr.mxu1 %v556_v0 }
 0x207   : > { %647 = vmatpush1.msra.mxu1 %v555_v1 }
 0x208   : > { %648 = vmatprep.subr.mxu1 %v554_v12 }
 0x209   : > { %649 = vmatpush1.msra.mxu1 %v553_v14  ;;  %v636_v14 = vsub.s32 1, %v1732_v37 }
 0x20a   : > { %650 = vmatprep.subr.mxu1 %v552_v36  ;;  %v563_v36 = vld [vmem:[%s1935_s4] sm:$0x3] }
 0x20b   : > { %651 = vmatpush1.msra.mxu1 %v551_v39  ;;  %v637_v39 = vrot.slane %v563_v36, %v636_v14 }
 0x20c   : > { %652 = vmatprep.subr.mxu1 %v550_v40 }
 0x20d   : > { %653 = vmatpush1.msra.mxu1 %v549_v41  ;;  %v633_v41 = vrot.slane %v563_v36, %v1735_v38  ;;  %v575_v36 = vld [vmem:[#allocation8 + $0x58] sm:$0xff] }
 0x20e   : > { %654 = vmatprep.subr.mxu1 %v548_v42 }
 0x20f   : > { %655 = vmatpush1.msra.mxu1 %v547_v43 }
 0x210   : > { %656 = vmatprep.subr.mxu1 %v546_v44 }
 0x211   : > { %657 = vmatpush1.msra.mxu1 %v545_v45 }
 0x212   : > { %658 = vmatprep.subr.mxu1 %v544_v46 }
 0x213   : > { %659 = vmatpush1.msra.mxu1 %v543_v47  ;;  %v595_v47 = vld [vmem:[#allocation8 + $0xf8] sm:$0xff] }
 0x214   : > { %660 = vmatprep.subr.mxu1 %v542_v48  ;;  %v594_v48 = vld [vmem:[#allocation8 + $0xf0] sm:$0xff]  ;;  %751 = vmatprep.subr.mxu0 %v595_v47  ;;  %v568_v47 = vld [vmem:[#allocation8 + $0x20] sm:$0xff] }
 0x215   : > { %661 = vmatpush1.msra.mxu1 %v541_v49  ;;  %v593_v49 = vld [vmem:[#allocation8 + $0xe8] sm:$0xff]  ;;  %752 = vmatpush1.msra.mxu0 %v594_v48  ;;  %v567_v48 = vld [vmem:[#allocation8 + $0x18] sm:$0xff] }
 0x216   : > { %662 = vmatprep.subr.mxu1 %v540_v50  ;;  %v592_v50 = vld [vmem:[#allocation8 + $0xe0] sm:$0xff]  ;;  %753 = vmatprep.subr.mxu0 %v593_v49  ;;  %v566_v49 = vld [vmem:[#allocation8 + $0x10] sm:$0xff] }
 0x217   : > { %663 = vmatpush1.msra.mxu1 %v539_v51  ;;  %v591_v51 = vld [vmem:[#allocation8 + $0xd8] sm:$0xff]  ;;  %754 = vmatpush1.msra.mxu0 %v592_v50  ;;  %v565_v50 = vld [vmem:[#allocation8 + $0x8] sm:$0xff] }
 0x218   : > { %664 = vmatprep.subr.mxu1 %v538_v52  ;;  %v590_v52 = vld [vmem:[#allocation8 + $0xd0] sm:$0xff]  ;;  %755 = vmatprep.subr.mxu0 %v591_v51  ;;  %v564_v51 = vld [vmem:[#allocation8] sm:$0xff] }
 0x219   : > { %665 = vmatpush1.msra.mxu1 %v537_v53  ;;  %v589_v53 = vld [vmem:[#allocation8 + $0xc8] sm:$0xff]  ;;  %756 = vmatpush1.msra.mxu0 %v590_v52  ;;  %v627_v52 = vld [vmem:[#allocation8 + $0x1f8] sm:$0xff] }
 0x21a   : > { %666 = vmatprep.subr.mxu1 %v536_v54  ;;  %v588_v54 = vld [vmem:[#allocation8 + $0xc0] sm:$0xff]  ;;  %757 = vmatprep.subr.mxu0 %v589_v53  ;;  %v626_v53 = vld [vmem:[#allocation8 + $0x1f0] sm:$0xff] }
 0x21b   : > { %667 = vmatpush1.msra.mxu1 %v535_v55  ;;  %v587_v55 = vld [vmem:[#allocation8 + $0xb8] sm:$0xff]  ;;  %758 = vmatpush1.msra.mxu0 %v588_v54  ;;  %v625_v54 = vld [vmem:[#allocation8 + $0x1e8] sm:$0xff] }
 0x21c   : > { %668 = vmatprep.subr.mxu1 %v534_v56  ;;  %v586_v56 = vld [vmem:[#allocation8 + $0xb0] sm:$0xff]  ;;  %759 = vmatprep.subr.mxu0 %v587_v55  ;;  %v624_v55 = vld [vmem:[#allocation8 + $0x1e0] sm:$0xff] }
 0x21d   : > { %669 = vmatpush1.msra.mxu1 %v533_v57  ;;  %v585_v57 = vld [vmem:[#allocation8 + $0xa8] sm:$0xff]  ;;  %760 = vmatpush1.msra.mxu0 %v586_v56  ;;  %v623_v56 = vld [vmem:[#allocation8 + $0x1d8] sm:$0xff] }
 0x21e   : > { %670 = vmatprep.subr.mxu1 %v532_v58  ;;  %v584_v58 = vld [vmem:[#allocation8 + $0xa0] sm:$0xff]  ;;  %761 = vmatprep.subr.mxu0 %v585_v57  ;;  %v622_v57 = vld [vmem:[#allocation8 + $0x1d0] sm:$0xff] }
 0x21f   : > { %671 = vmatpush1.msra.mxu1 %v531_v59  ;;  %v583_v59 = vld [vmem:[#allocation8 + $0x98] sm:$0xff]  ;;  %762 = vmatpush1.msra.mxu0 %v584_v58 }
 0x220   : > { %763 = vmatprep.subr.mxu0 %v583_v59 }
 0x221   : > { %764 = vmatpush1.msra.mxu0 %v582_v60 }
 0x28b   : > { %v458_v61 = vpop.xlane.xlu1 %457 }
 0x28c   : > { %1207 = vrcp.f32 %v458_v61  ;;  %v581_v61 = vld [vmem:[#allocation8 + $0x88] sm:$0xff] }
 0x28d   : > { %765 = vmatprep.subr.mxu0 %v581_v61 }
 0x299   : > { %v1208_v1 = vpop.eup %1207 }
 0x2c0   : > { %v1124_v62 = vpop.f32.mrf.mxu1 }
 0x2c2   : > { %v1125_v63 = vpop.f32.mrf.mxu1 }
 0x2c3   : > { %v1126_v0 = vadd.f32 %v1125_v63, %v1124_v62  ;;  %v580_v62 = vld [vmem:[#allocation8 + $0x80] sm:$0xff]  ;;  %v579_v63 = vld [vmem:[#allocation8 + $0x78] sm:$0xff] }
 0x2c4   : > { %766 = vmatpush1.msra.mxu0 %v580_v62 }
 0x2c5   : > { %v530_v12 = vmul.f32 %v1208_v1, %v1126_v0  ;;  %v578_v0 = vld [vmem:[#allocation8 + $0x70] sm:$0xff]  ;;  %v577_v1 = vld [vmem:[#allocation8 + $0x68] sm:$0xff]  ;;  %767 = vmatprep.subr.mxu0 %v579_v63 }
 0x2c6   : > { %768 = vmatpush1.msra.mxu0 %v578_v0 }
 0x2c7   : > { %705 = vmatmul.mubr.f32.vlgmr.msra.gmra.mxu1 %v530_v12  ;;  %v576_v12 = vld [vmem:[#allocation8 + $0x60] sm:$0xff]  ;;  %769 = vmatprep.subr.mxu0 %v577_v1 }
 0x2c8   : > { %770 = vmatpush1.msra.mxu0 %v576_v12 }
 0x2c9   : > { %771 = vmatprep.subr.mxu0 %v575_v36 }
 0x387   : > { %v706_v40 = vpop.f32.mrf.mxu1 }
 0x388   : > { %v1751_v44 = vadd.f32 %v706_v40, %v633_v41  ;;  %v573_v40 = vld [vmem:[#allocation8 + $0x48] sm:$0xff]  ;;  %v572_v41 = vld [vmem:[#allocation8 + $0x40] sm:$0xff] }
 0x389   : > { %v708_v42 = vpop.f32.mrf.mxu1 }
 0x38a   : > { %v1749_v43 = vadd.f32 %v708_v42, %v637_v39  ;;  %v711_v46 = vsel %vm442_vm0, %v1751_v44, 0.0  ;;  %v574_v39 = vld [vmem:[#allocation8 + $0x50] sm:$0xff]  ;;  %v571_v42 = vld [vmem:[#allocation8 + $0x38] sm:$0xff] }
 0x38b   : > { %772 = vmatpush1.msra.mxu0 %v574_v39  ;;  %v621_v39 = vld [vmem:[#allocation8 + $0x1c8] sm:$0xff] }
 0x38c   : > { %v726_v45 = vsel %vm442_vm0, %v1749_v43, 0.0  ;;  %773 = vmatprep.subr.mxu0 %v573_v40  ;;  %v619_v40 = vld [vmem:[#allocation8 + $0x1b8] sm:$0xff] }
 0x38d   : > { %727 = vadd.xlane.f32.xlu1 %v726_v45  ;;  %v570_v45 = vld [vmem:[#allocation8 + $0x30] sm:$0xff]  ;;  %774 = vmatpush1.msra.mxu0 %v572_v41 }
 0x38e   : > { %775 = vmatprep.subr.mxu0 %v571_v42  ;;  %v618_v41 = vld [vmem:[#allocation8 + $0x1b0] sm:$0xff]  ;;  %v617_v42 = vld [vmem:[#allocation8 + $0x1a8] sm:$0xff] }
 0x38f   : > { %776 = vmatpush1.msra.mxu0 %v570_v45  ;;  %v615_v45 = vld [vmem:[#allocation8 + $0x198] sm:$0xff] }
 0x391   : > { %712 = vadd.xlane.f32.xlu1 %v711_v46  ;;  %v569_v46 = vld [vmem:[#allocation8 + $0x28] sm:$0xff] }
 0x392   : > { %777 = vmatprep.subr.mxu0 %v569_v46  ;;  %v614_v46 = vld [vmem:[#allocation8 + $0x190] sm:$0xff] }
 0x393   : > { %778 = vmatpush1.msra.mxu0 %v568_v47  ;;  %v613_v47 = vld [vmem:[#allocation8 + $0x188] sm:$0xff] }
 0x394   : > { %779 = vmatprep.subr.mxu0 %v567_v48  ;;  %v612_v48 = vld [vmem:[#allocation8 + $0x180] sm:$0xff] }
 0x395   : > { %780 = vmatpush1.msra.mxu0 %v566_v49  ;;  %v611_v49 = vld [vmem:[#allocation8 + $0x178] sm:$0xff] }
 0x396   : > { %781 = vmatprep.subr.mxu0 %v565_v50  ;;  %v610_v50 = vld [vmem:[#allocation8 + $0x170] sm:$0xff] }
 0x397   : > { %782 = vmatpush1.msra.mxu0 %v564_v51  ;;  %v609_v51 = vld [vmem:[#allocation8 + $0x168] sm:$0xff] }
 0x398   : > { %783 = vmatprep.subr.mxu0 %v627_v52  ;;  %v608_v52 = vld [vmem:[#allocation8 + $0x160] sm:$0xff] }
 0x399   : > { %784 = vmatpush2.msra.mxu0 %v626_v53  ;;  %v607_v53 = vld [vmem:[#allocation8 + $0x158] sm:$0xff] }
 0x39a   : > { %785 = vmatprep.subr.mxu0 %v625_v54  ;;  %v606_v54 = vld [vmem:[#allocation8 + $0x150] sm:$0xff] }
 0x39b   : > { %786 = vmatpush2.msra.mxu0 %v624_v55  ;;  %v605_v55 = vld [vmem:[#allocation8 + $0x148] sm:$0xff] }
 0x39c   : > { %787 = vmatprep.subr.mxu0 %v623_v56  ;;  %v604_v56 = vld [vmem:[#allocation8 + $0x140] sm:$0xff] }
 0x39d   : > { %788 = vmatpush2.msra.mxu0 %v622_v57  ;;  %v603_v57 = vld [vmem:[#allocation8 + $0x138] sm:$0xff] }
 0x39e   : > { %789 = vmatprep.subr.mxu0 %v621_v39 }
 0x416   : > { %v728_v58 = vpop.xlane.xlu1 %727 }
 0x417   : > { %v729_v59 = vmul.f32 0.0078125, %v728_v58  ;;  %v602_v58 = vld [vmem:[#allocation8 + $0x130] sm:$0xff] }
 0x419   : > { %v1758_v60 = vsub.f32 %v1749_v43, %v729_v59  ;;  %v620_v43 = vld [vmem:[#allocation8 + $0x1c0] sm:$0xff]  ;;  %v601_v59 = vld [vmem:[#allocation8 + $0x128] sm:$0xff] }
 0x41a   : > { %v713_v61 = vpop.xlane.xlu1 %712  ;;  %790 = vmatpush2.msra.mxu0 %v620_v43 }
 0x41b   : > { %v715_v62 = vmul.f32 0.0078125, %v713_v61  ;;  %v731_v63 = vmul.f32 %v1758_v60, %v1758_v60  ;;  %791 = vmatprep.subr.mxu0 %v619_v40  ;;  %v600_v61 = vld [vmem:[#allocation8 + $0x120] sm:$0xff] }
 0x41c   : > { %792 = vmatpush2.msra.mxu0 %v618_v41 }
 0x41d   : > { %v1763_v0 = vsub.f32 %v1751_v44, %v715_v62  ;;  %v732_v1 = vsel %vm442_vm0, %v731_v63, 0.0  ;;  %793 = vmatprep.subr.mxu0 %v617_v42  ;;  %v616_v44 = vld [vmem:[#allocation8 + $0x1a0] sm:$0xff]  ;;  %v599_v62 = vld [vmem:[#allocation8 + $0x118] sm:$0xff]  ;;  %v598_v63 = vld [vmem:[#allocation8 + $0x110] sm:$0xff] }
 0x41e   : > { %733 = vadd.xlane.f32.xlu1 %v732_v1  ;;  %794 = vmatpush2.msra.mxu0 %v616_v44  ;;  %v597_v1 = vld [vmem:[#allocation8 + $0x108] sm:$0xff] }
 0x41f   : > { %v717_v12 = vmul.f32 %v1763_v0, %v1763_v0  ;;  %795 = vmatprep.subr.mxu0 %v615_v45 }
 0x420   : > { %796 = vmatpush2.msra.mxu0 %v614_v46 }
 0x421   : > { %v718_v36 = vsel %vm442_vm0, %v717_v12, 0.0  ;;  %797 = vmatprep.subr.mxu0 %v613_v47  ;;  %v596_v12 = vld [vmem:[#allocation8 + $0x100] sm:$0xff] }
 0x422   : > { %719 = vadd.xlane.f32.xlu1 %v718_v36  ;;  %798 = vmatpush2.msra.mxu0 %v612_v48 }
 0x423   : > { %799 = vmatprep.subr.mxu0 %v611_v49 }
 0x424   : > { %800 = vmatpush2.msra.mxu0 %v610_v50  ;;  %v628_v50 = vld [vmem:[%s1937_s6] sm:$0x3] }
 0x425   : > { %801 = vmatprep.subr.mxu0 %v609_v51  ;;  %v744_v51 = vrot.slane %v628_v50, %v1735_v38 }
 0x426   : > { %802 = vmatpush2.msra.mxu0 %v608_v52 }
 0x427   : > { %803 = vmatprep.subr.mxu0 %v607_v53 }
 0x428   : > { %804 = vmatpush2.msra.mxu0 %v606_v54 }
 0x429   : > { %805 = vmatprep.subr.mxu0 %v605_v55 }
 0x42a   : > { %806 = vmatpush2.msra.mxu0 %v604_v56 }
 0x42b   : > { %807 = vmatprep.subr.mxu0 %v603_v57  ;;  %v748_v57 = vrot.slane %v628_v50, %v636_v14 }
 0x42c   : > { %808 = vmatpush2.msra.mxu0 %v602_v58 }
 0x42d   : > { %809 = vmatprep.subr.mxu0 %v601_v59 }
 0x42e   : > { %810 = vmatpush2.msra.mxu0 %v600_v61 }
 0x42f   : > { %811 = vmatprep.subr.mxu0 %v599_v62 }
 0x430   : > { %812 = vmatpush2.msra.mxu0 %v598_v63 }
 0x431   : > { %813 = vmatprep.subr.mxu0 %v597_v1 }
 0x432   : > { %814 = vmatpush2.msra.mxu0 %v596_v12 }
 0x4a7   : > { %v734_v36 = vpop.xlane.xlu1 %733 }
 0x4a8   : > { %v735_v39 = vmul.f32 0.0078125, %v734_v36 }
 0x4aa   : > { %v736_v43 = vadd.f32 1e-05, %v735_v39 }
 0x4ab   : > { %v720_v40 = vpop.xlane.xlu1 %719 }
 0x4ac   : > { %1209 = vrsqrt.f32 %v736_v43  ;;  %v721_v41 = vmul.f32 0.0078125, %v720_v40 }
 0x4ae   : > { %v722_v42 = vadd.f32 1e-05, %v721_v41 }
 0x4b0   : > { %1211 = vrsqrt.f32 %v722_v42 }
 0x4b9   : > { %v1210_v44 = vpop.eup %1209 }
 0x4ba   : > { %v738_v45 = vmul.f32 %v1210_v44, %v1758_v60 }
 0x4bc   : > { %v739_v46 = vmax.f32 %v738_v45, 0.0 }
 0x4bd   : > { %v1212_v47 = vpop.eup %1211 }
 0x4be   : > { %815 = vmatprep.mubr.f32.mxu0 %v739_v46  ;;  %v724_v48 = vmul.f32 %v1212_v47, %v1763_v0 }
 0x4c0   : > { %v725_v49 = vmax.f32 %v724_v48, 0.0 }
 0x4c2   : > { %816 = vmatmul.mubr.f32.vlgmr.msra.gmra.mxu0 %v725_v49 }
 0x582   : > { %v817_v52 = vpop.f32.mrf.mxu0 }
 0x583   : > { %v818_v53 = vadd.f32 %v817_v52, %v744_v51 }
 0x584   : > { %v819_v0 = vpop.f32.mrf.mxu0 }
 0x585   : > { %v822_v54 = vsub.f32 0.0, %v818_v53  ;;  %v820_v58 = vadd.f32 %v819_v0, %v748_v57 }
 0x587   : > { %v823_v55 = vmul.f32 1.442695, %v822_v54  ;;  %v1779_v62 = vrot.slane %v820_v58, %v1735_v38 }
 0x589   : > { %1213 = vpow2.f32 %v823_v55 }
 0x596   : > { %v1214_v56 = vpop.eup %1213 }
 0x597   : > { %v825_v60 = vadd.f32 1.0, %v1214_v56 }
 0x599   : > { %1215 = vrcp.f32 %v825_v60 }
 0x5a6   : > { %v1216_v59 = vpop.eup %1215 }
 0x5a7   : > { %v831_v61 = vrot.slane %v1216_v59, %v1735_v38 }
 0x5a9   : > { %v832_v63 = vmul.f32 %v831_v61, %v1712_v35  ;;  %v833_v1 = vmul.f32 %v831_v61, %v1703_v33  ;;  %v834_v12 = vmul.f32 %v831_v61, %v1694_v31  ;;  %v835_v36 = vmul.f32 %v831_v61, %v1685_v29 }
 0x5aa   : > { %v836_v39 = vmul.f32 %v831_v61, %v1676_v27  ;;  %v837_v37 = vmul.f32 %v831_v61, %v1667_v25  ;;  %v838_v14 = vmul.f32 %v831_v61, %v1658_v23  ;;  %v839_v43 = vmul.f32 %v831_v61, %v1649_v21 }
 0x5ab   : > { %v840_v40 = vmul.f32 %v831_v61, %v1640_v19  ;;  %v841_v38 = vmul.f32 %v831_v61, %v1631_v17  ;;  %v842_v35 = vmul.f32 %v831_v61, %v1622_v15  ;;  %v843_v33 = vmul.f32 %v831_v61, %v1606_v11 }
 0x5ac   : > { %v844_v31 = vmul.f32 %v831_v61, %v1598_v9  ;;  %v845_v29 = vmul.f32 %v831_v61, %v1588_v7  ;;  %v846_v27 = vmul.f32 %v831_v61, %v1580_v5  ;;  %v847_v25 = vmul.f32 %v831_v61, %v1569_v3 }
 0x5ad   : > { %v848_v23 = vmul.f32 %v831_v61, %v1708_v34  ;;  %v849_v21 = vmul.f32 %v831_v61, %v1698_v32  ;;  %v850_v19 = vmul.f32 %v831_v61, %v1690_v30  ;;  %v851_v17 = vmul.f32 %v831_v61, %v1680_v28 }
 0x5ae   : > { %v852_v15 = vmul.f32 %v831_v61, %v1672_v26  ;;  %v853_v11 = vmul.f32 %v831_v61, %v1662_v24  ;;  %v854_v9 = vmul.f32 %v831_v61, %v1654_v22  ;;  %v855_v7 = vmul.f32 %v831_v61, %v1644_v20 }
 0x5af   : > { %v856_v5 = vmul.f32 %v831_v61, %v1636_v18  ;;  %v857_v3 = vmul.f32 %v831_v61, %v1626_v16  ;;  %v858_v34 = vmul.f32 %v831_v61, %v1618_v13  ;;  %v859_v32 = vmul.f32 %v831_v61, %v1602_v10 }
 0x5b0   : > { %v860_v30 = vmul.f32 %v831_v61, %v1593_v8  ;;  %v861_v28 = vmul.f32 %v831_v61, %v1584_v6  ;;  %v862_v26 = vmul.f32 %v831_v61, %v1572_v4  ;;  %v863_v24 = vmul.f32 %v831_v61, %v1566_v2 }
 0x5b1   : > { %v868_v22 = vadd.f32 %v1779_v62, %v832_v63  ;;  %v869_v20 = vadd.f32 %v1779_v62, %v833_v1  ;;  %v870_v18 = vadd.f32 %v1779_v62, %v834_v12  ;;  %v871_v16 = vadd.f32 %v1779_v62, %v835_v36 }
 0x5b2   : > { %v872_v13 = vadd.f32 %v1779_v62, %v836_v39  ;;  %v873_v10 = vadd.f32 %v1779_v62, %v837_v37  ;;  %v874_v8 = vadd.f32 %v1779_v62, %v838_v14  ;;  %v875_v6 = vadd.f32 %v1779_v62, %v839_v43 }
 0x5b3   : > { %v876_v4 = vadd.f32 %v1779_v62, %v840_v40  ;;  %v877_v2 = vadd.f32 %v1779_v62, %v841_v38  ;;  %v878_v41 = vadd.f32 %v1779_v62, %v842_v35  ;;  %v879_v42 = vadd.f32 %v1779_v62, %v843_v33  ;;  %900 = vst [vmem:[%s1827_s17] sm:$0xff] %v868_v22 }
 0x5b4   : > { %901 = vst [vmem:[%s1827_s17 + $0x8] sm:$0xff] %v869_v20  ;;  %902 = vst [vmem:[%s1827_s17 + $0x10] sm:$0xff] %v870_v18  ;;  %v880_v44 = vadd.f32 %v1779_v62, %v844_v31  ;;  %v881_v45 = vadd.f32 %v1779_v62, %v845_v29  ;;  %v882_v46 = vadd.f32 %v1779_v62, %v846_v27 }
 0x5b5   : > { %903 = vst [vmem:[%s1827_s17 + $0x18] sm:$0xff] %v871_v16  ;;  %v883_v47 = vadd.f32 %v1779_v62, %v847_v25  ;;  %904 = vst [vmem:[%s1827_s17 + $0x20] sm:$0xff] %v872_v13  ;;  %v884_v48 = vadd.f32 %v1779_v62, %v848_v23  ;;  %v885_v49 = vadd.f32 %v1779_v62, %v849_v21 }
 0x5b6   : > { %905 = vst [vmem:[%s1827_s17 + $0x28] sm:$0xff] %v873_v10  ;;  %906 = vst [vmem:[%s1827_s17 + $0x30] sm:$0xff] %v874_v8  ;;  %v886_v50 = vadd.f32 %v1779_v62, %v850_v19  ;;  %v887_v51 = vadd.f32 %v1779_v62, %v851_v17  ;;  %v888_v52 = vadd.f32 %v1779_v62, %v852_v15 }
 0x5b7   : > { %907 = vst [vmem:[%s1827_s17 + $0x38] sm:$0xff] %v875_v6  ;;  %908 = vst [vmem:[%s1827_s17 + $0x40] sm:$0xff] %v876_v4  ;;  %v889_v53 = vadd.f32 %v1779_v62, %v853_v11  ;;  %v890_v54 = vadd.f32 %v1779_v62, %v854_v9  ;;  %v891_v55 = vadd.f32 %v1779_v62, %v855_v7 }
 0x5b8   : > { %909 = vst [vmem:[%s1827_s17 + $0x48] sm:$0xff] %v877_v2  ;;  %910 = vst [vmem:[%s1827_s17 + $0x50] sm:$0xff] %v878_v41  ;;  %v892_v56 = vadd.f32 %v1779_v62, %v856_v5  ;;  %v893_v60 = vadd.f32 %v1779_v62, %v857_v3  ;;  %v894_v57 = vadd.f32 %v1779_v62, %v858_v34 }
 0x5b9   : > { %911 = vst [vmem:[%s1827_s17 + $0x58] sm:$0xff] %v879_v42  ;;  %912 = vst [vmem:[%s1827_s17 + $0x60] sm:$0xff] %v880_v44  ;;  %v895_v0 = vadd.f32 %v1779_v62, %v859_v32  ;;  %v896_v58 = vadd.f32 %v1779_v62, %v860_v30  ;;  %v897_v59 = vadd.f32 %v1779_v62, %v861_v28 }
 0x5ba   : > { %913 = vst [vmem:[%s1827_s17 + $0x68] sm:$0xff] %v881_v45  ;;  %914 = vst [vmem:[%s1827_s17 + $0x70] sm:$0xff] %v882_v46  ;;  %v898_v61 = vadd.f32 %v1779_v62, %v862_v26  ;;  %v899_v63 = vadd.f32 %v1779_v62, %v863_v24 }
 0x5bb   : > { %915 = vst [vmem:[%s1827_s17 + $0x78] sm:$0xff] %v883_v47  ;;  %916 = vst [vmem:[%s1827_s17 + $0x80] sm:$0xff] %v884_v48 }
 0x5bc   : > { %917 = vst [vmem:[%s1827_s17 + $0x88] sm:$0xff] %v885_v49  ;;  %918 = vst [vmem:[%s1827_s17 + $0x90] sm:$0xff] %v886_v50 }
 0x5bd   : > { %919 = vst [vmem:[%s1827_s17 + $0x98] sm:$0xff] %v887_v51  ;;  %920 = vst [vmem:[%s1827_s17 + $0xa0] sm:$0xff] %v888_v52 }
 0x5be   : > { %921 = vst [vmem:[%s1827_s17 + $0xa8] sm:$0xff] %v889_v53  ;;  %922 = vst [vmem:[%s1827_s17 + $0xb0] sm:$0xff] %v890_v54 }
 0x5bf   : > { %923 = vst [vmem:[%s1827_s17 + $0xb8] sm:$0xff] %v891_v55  ;;  %924 = vst [vmem:[%s1827_s17 + $0xc0] sm:$0xff] %v892_v56 }
 0x5c0   : > { %925 = vst [vmem:[%s1827_s17 + $0xc8] sm:$0xff] %v893_v60  ;;  %926 = vst [vmem:[%s1827_s17 + $0xd0] sm:$0xff] %v894_v57 }
 0x5c1   : > { %927 = vst [vmem:[%s1827_s17 + $0xd8] sm:$0xff] %v895_v0  ;;  %928 = vst [vmem:[%s1827_s17 + $0xe0] sm:$0xff] %v896_v58 }
 0x5c2   : > { %929 = vst [vmem:[%s1827_s17 + $0xe8] sm:$0xff] %v897_v59  ;;  %930 = vst [vmem:[%s1827_s17 + $0xf0] sm:$0xff] %v898_v61 }
 0x5c3   : > { %931 = vst [vmem:[%s1827_s17 + $0xf8] sm:$0xff] %v899_v63 }
 0x5c4   : > { %1310 = shalt.err (!%p1307_p9)
}
 0x5c5   : > { %s1311_s18 = scalar_lea.hbm %s1870_s30, 4096  ;;  %s1315_s22 = scalar_lea.hbm %s1938_s7, 8192 }
 0x5c6   : > { %p1312_p13 = scmp.ne.s32.totalorder %s1870_s30, %s1311_s18  ;;  %p1316_p4 = scmp.lt.s32.totalorder %s1870_s30, %s1938_s7 }
 0x5c7   : > { %p1317_p8 = scmp.lt.s32.totalorder %s1315_s22, %s1311_s18 }
 0x5c8   : > { %p1313_p5 = pnand %p1312_p13, %p1954_p10 }
 0x5c9   : > { %p1318_p3 = por %p1317_p8, %p1316_p4 }
 0x5ca   : > { %p1314_p0 = pneg %p1313_p5 }
 0x5cc   : > { %p1319_p11 = pnand %p1318_p3, %p1314_p0 }
 0x5ce   : > { %1322 = shalt.err (!%p1319_p11)
}
 0x5cf   : > { %s1377_s2 = smov 128   ;;  %s1378_s23 = smov 8  }
 0x5d0   : > { %1137 = dma.vmem_to_hbm [thread:$0]  (%p1954_p10), %s1872_s25, 4096, %s1870_s30, %s933_s15, %s1377_s2, %s1377_s2, %s1378_s23  }
 0x5d1 PF: > { %s961_s16 = sand.u32 1, %s1353_s26   ;;  %p1955_p1 = scmp.ne.s32.totalorder %s1944_s9, 0 }
 0x5d2   : > { %p1956_p2 = scmp.ge.s32.totalorder %s1365_s29, 2  ;;  %s962_s13 = scalar_lea.sflag [#allocation5], %s961_s16 }
 0x5d4   : > { %p1151_p6 = pnand %p1956_p2, %p1955_p1 }
 0x5d6   : > { %p1152_p12 = pneg %p1151_p6 }
 0x5d8   : > { %1348 = dma.done.wait (%p1152_p12), %s962_s13, 4096  }
 0x5d9   : > { %1350 = vsyncadd (%p1152_p12), %s962_s13, 4294963200  ;;  %p23_p7 = scmp.ge.s32.totalorder %s1494_s24, 4   ;;  %s1957_s26 = smov %s1357_s27 }
 0x5da   : > { %s1958_s27 = smov %s1361_s28  ;;  %s1959_s28 = smov %s1510_s12 }
 0x5db   : > { %s1960_s29 = smov %s1494_s24  ;;  %25 = sbr.rel (!%p23_p7) target bundleno = 9 (0x9), region = 101 }
 0x5e0   :  { %967 = vsyncpa [#allocation4], 1 }
 0x5e1   :  { %969 = vsyncpa [#allocation4 + $0x1], 1 }
 0x5e2   :  { %970 = vsyncpa [#allocation7], 1 }
 0x5e3   :  { %971 = vsyncpa [#allocation5], 1 }
 0x5e4   :  { %973 = vsyncpa [#allocation5 + $0x1], 1 }

</bundles_post_ra>
